<compile_context>
chip_gen: v7x
topology: tpu7x:2x2x1
jax: 0.10.0
libtpu: 0.0.40
codegen_flags: <defaults>
</compile_context>

<pallas_src>
import functools

import jax
import jax.numpy as jnp
from jax.experimental import pallas as pl
from jax.experimental.pallas import tpu as pltpu


def _round_up(x, m):
    return (x + m - 1) // m * m


def _num_tensorcores():
    """Best-effort TensorCore count (2 on v7x, 1 on v5e/v6e)."""
    try:
        info = pltpu.get_tpu_info()
        for attr in ("num_cores", "core_count", "num_tensor_cores",
                     "num_tensorcores"):
            val = getattr(info, attr, None)
            if val:
                return max(1, int(val))
    except Exception:
        pass
    try:
        kind = jax.devices()[0].device_kind.lower()
        if "7" in kind:
            return 2
    except Exception:
        pass
    return 1


def _vmem_limit_bytes():
    try:
        cap = int(pltpu.get_tpu_info().vmem_capacity_bytes)
    except Exception:
        cap = 64 * 1024 * 1024              # v7x per-TC floor
    return int(min(cap * 3 // 4, 96 * 1024 * 1024))


def _cos_mse_kernel(a_ref, b_ref, lbl_ref, part_ref, acc_ref, *, num_inner):
    k = pl.program_id(1)                    # "arbitrary" reduction over tiles

    @pl.when(k == 0)
    def _():
        acc_ref[...] = jnp.zeros_like(acc_ref)

    a = a_ref[...].astype(jnp.float32)
    b = b_ref[...].astype(jnp.float32)

    # Row-wise cosine similarity (torch.cosine_similarity, dim=1, eps=1e-8).
    dot = jnp.sum(a * b, axis=-1, keepdims=True)
    na2 = jnp.sum(a * a, axis=-1, keepdims=True)
    nb2 = jnp.sum(b * b, axis=-1, keepdims=True)
    eps2 = jnp.float32(1e-16)               # eps^2 on squared norms == torch eps
    # Two rsqrt (EUP slot, ~free) instead of rsqrt(na2*nb2): avoids overflow.
    cos = (dot
           * jax.lax.rsqrt(jnp.maximum(na2, eps2))
           * jax.lax.rsqrt(jnp.maximum(nb2, eps2)))

    # Labels are a per-tile (tile_b, 1) block riding the same pipeline.
    err = cos - lbl_ref[...].astype(jnp.float32)

    # Scalar running sum: no lane-padded (tile_b, 1) accumulator, just a
    # cross-sublane reduce into a tiny VMEM cell, hidden under the DMAs.
    acc_ref[...] += jnp.sum(err * err)

    @pl.when(k == num_inner - 1)
    def _():
        part_ref[...] = jnp.broadcast_to(jnp.sum(acc_ref[...]), part_ref.shape)


def _cos_loss_partials(rep_a, rep_b, labels2d, *, tile_b, num_outer,
                       vmem_limit):
    B, D = rep_a.shape
    itemsize = rep_a.dtype.itemsize

    # Feature padding: keep DMA rows lane-dense (D multiple of 128).
    Dpad = _round_up(D, 128)
    if Dpad != D:
        rep_a = jnp.pad(rep_a, ((0, 0), (0, Dpad - D)))
        rep_b = jnp.pad(rep_b, ((0, 0), (0, Dpad - D)))

    # Batch padding: multiple of num_outer*tile_b.  Zero rows give cos == 0
    # and label == 0, hence contribute nothing to the sum.
    B_pad = _round_up(B, num_outer * tile_b)
    if B_pad != B:
        pad = B_pad - B
        rep_a = jnp.pad(rep_a, ((0, pad), (0, 0)))
        rep_b = jnp.pad(rep_b, ((0, pad), (0, 0)))
        labels2d = jnp.pad(labels2d, ((0, pad), (0, 0)))

    num_tiles = B_pad // tile_b
    num_inner = num_tiles // num_outer

    kernel = functools.partial(_cos_mse_kernel, num_inner=num_inner)

    cost = pl.CostEstimate(
        flops=6 * B_pad * Dpad + 16 * B_pad,
        transcendentals=2 * B_pad,
        bytes_accessed=(2 * B_pad * Dpad * itemsize + 4 * B_pad
                        + 4 * num_outer * 8 * 128),
    )

    if num_outer > 1:
        dim_sems = (pltpu.CORE_PARALLEL, pltpu.ARBITRARY)
    else:
        dim_sems = (pltpu.ARBITRARY, pltpu.ARBITRARY)

    return pl.pallas_call(
        kernel,
        out_shape=jax.ShapeDtypeStruct((num_outer * 8, 128), jnp.float32),
        grid_spec=pltpu.PrefetchScalarGridSpec(
            num_scalar_prefetch=0,
            grid=(num_outer, num_inner),
            in_specs=[
                pl.BlockSpec((tile_b, Dpad),
                             lambda o, k: (o * num_inner + k, 0)),
                pl.BlockSpec((tile_b, Dpad),
                             lambda o, k: (o * num_inner + k, 0)),
                # Per-tile label blocks (bounded footprint, pipelined for free).
                pl.BlockSpec((tile_b, 1),
                             lambda o, k: (o * num_inner + k, 0)),
            ],
            out_specs=pl.BlockSpec((8, 128), lambda o, k: (o, 0)),
            scratch_shapes=[pltpu.VMEM((1, 1), jnp.float32)],
        ),
        compiler_params=pltpu.CompilerParams(
            dimension_semantics=dim_sems,
            vmem_limit_bytes=vmem_limit,
        ),
        cost_estimate=cost,
    )(rep_a, rep_b, labels2d)


def cosine_similarity_loss(rep_a, rep_b, labels, *, tile_b=None):
    """Pallas implementation of CosineSimilarityLoss.forward (labels given)."""
    B, D = rep_a.shape
    assert rep_b.shape == (B, D)
    labels2d = jnp.asarray(labels, jnp.float32).reshape(B, 1)

    itemsize = rep_a.dtype.itemsize
    align = 16 if itemsize < 4 else 8       # sublane packing for bf16 / f32
    Dpad = _round_up(D, 128)
    num_outer = _num_tensorcores()
    vmem_limit = _vmem_limit_bytes()

    if tile_b is None:
        # Double-buffered per-row footprint: rep_a + rep_b rows (lane-padded D)
        # plus one lane-padded (1 -> 128) f32 label row.
        bytes_per_row = 2 * (2 * Dpad * itemsize + 128 * 4)
        budget = min(24 * 1024 * 1024, vmem_limit // 2)
        tile_b = budget // bytes_per_row
        # Keep several grid steps per core so the pipeline can hide the DMAs.
        steps_cap = max(align,
                        (_round_up(B, align) // (8 * num_outer)) // align * align)
        tile_b = min(tile_b, steps_cap)
    tile_b = max(align, min(int(tile_b), _round_up(B, align)))
    tile_b = tile_b // align * align

    try:
        partials = _cos_loss_partials(rep_a, rep_b, labels2d, tile_b=tile_b,
                                      num_outer=num_outer,
                                      vmem_limit=vmem_limit)
    except Exception:
        if num_outer == 1:
            raise
        # Robust fallback: single-core layout.
        partials = _cos_loss_partials(rep_a, rep_b, labels2d, tile_b=tile_b,
                                      num_outer=1, vmem_limit=vmem_limit)

    # One scalar partial per outer program (broadcast over its (8,128) block);
    # divide by the true (unpadded) batch size.
    return jnp.sum(partials[::8, 0]) / jnp.float32(B)


def _reference(rep_a, rep_b, labels):
    a = rep_a.astype(jnp.float32)
    b = rep_b.astype(jnp.float32)
    dot = jnp.sum(a * b, axis=-1)
    na = jnp.maximum(jnp.linalg.norm(a, axis=-1), 1e-8)
    nb = jnp.maximum(jnp.linalg.norm(b, axis=-1), 1e-8)
    cos = dot / (na * nb)
    return jnp.mean((cos - labels.reshape(-1)) ** 2)


if __name__ == "__main__":
    key = jax.random.PRNGKey(0)

    def _check(B, D, tile_b=None, dtype=jnp.float32, tol=1e-5):
        k_a, k_b, k_l = jax.random.split(
            jax.random.fold_in(key, B * 1000 + D), 3)
        rep_a = jax.random.normal(k_a, (B, D), dtype=dtype)
        rep_b = jax.random.normal(k_b, (B, D), dtype=dtype)
        labels = jax.random.uniform(k_l, (B,), dtype=jnp.float32)
        loss = jax.block_until_ready(
            cosine_similarity_loss(rep_a, rep_b, labels, tile_b=tile_b))
        ref = _reference(rep_a, rep_b, labels)
        assert jnp.allclose(loss, ref, atol=tol, rtol=tol), (B, D, loss, ref)

    _check(16, 32)                                   # toy batch, D padded 32->128
    _check(64, 128, tile_b=16)                       # multi-tile reduction
    _check(20, 32, tile_b=16)                        # ragged batch -> zero tail
    _check(64, 384, dtype=jnp.bfloat16, tol=1e-4)    # bf16 embeddings fed directly
    print("KERNEL_OK")
</pallas_src>

<mosaic_0001>
module attributes {stable_mosaic.version = 11 : i64} {
  func.func @_cos_mse_kernel(%arg0: i32, %arg1: i32, %arg2: memref<8x128xf32, #tpu.memory_space<vmem>>, %arg3: memref<8x128xf32, #tpu.memory_space<vmem>>, %arg4: memref<8x1xf32, #tpu.memory_space<vmem>>, %arg5: memref<8x128xf32, #tpu.memory_space<vmem>>, %arg6: memref<1x1xf32, #tpu.memory_space<vmem>>) attributes {dimension_semantics = [#tpu.dimension_semantics<arbitrary>, #tpu.dimension_semantics<arbitrary>], iteration_bounds = array<i64: 1, 2>, scalar_prefetch = 0 : i64, scratch_operands = 1 : i64, tpu.core_type = #tpu.core_type<tc>, window_params = [{transform_indices = @transform_0, window_bounds = array<i64: 8, 128>}, {transform_indices = @transform_1, window_bounds = array<i64: 8, 128>}, {transform_indices = @transform_2, window_bounds = array<i64: 8, 1>}, {transform_indices = @transform_3, window_bounds = array<i64: 8, 128>}]} {
    %c0_i32 = arith.constant 0 : i32
    %0 = arith.cmpi eq, %arg1, %c0_i32 : i32
    %1 = arith.extui %0 : i1 to i32
    %c0_i32_0 = arith.constant 0 : i32
    %2 = arith.cmpi ne, %1, %c0_i32_0 : i32
    scf.if %2 {
      %cst_16 = arith.constant 0.000000e+00 : f32
      %36 = vector.broadcast %cst_16 : f32 to vector<1x1xf32>
      %c0_17 = arith.constant 0 : index
      %c0_18 = arith.constant 0 : index
      %37 = vector.load %arg6[%c0_17, %c0_18] : memref<1x1xf32, #tpu.memory_space<vmem>>, vector<1x1xf32>
      tpu.vector_store %arg6[%c0_17, %c0_18], %36 {strides = array<i32>} : memref<1x1xf32, #tpu.memory_space<vmem>>, vector<1x1xf32>,
    } else {
    }
    %c0 = arith.constant 0 : index
    %c0_1 = arith.constant 0 : index
    %3 = vector.load %arg2[%c0, %c0_1] : memref<8x128xf32, #tpu.memory_space<vmem>>, vector<8x128xf32>
    %c0_2 = arith.constant 0 : index
    %c0_3 = arith.constant 0 : index
    %4 = vector.load %arg3[%c0_2, %c0_3] : memref<8x128xf32, #tpu.memory_space<vmem>>, vector<8x128xf32>
    %5 = arith.mulf %3, %4 : vector<8x128xf32>
    %cst = arith.constant dense<0.000000e+00> : vector<8xf32>
    %6 = vector.multi_reduction <add>, %5, %cst [1] : vector<8x128xf32> to vector<8xf32>
    %7 = vector.shape_cast %6 : vector<8xf32> to vector<8x1xf32>
    %8 = arith.mulf %3, %3 : vector<8x128xf32>
    %cst_4 = arith.constant dense<0.000000e+00> : vector<8xf32>
    %9 = vector.multi_reduction <add>, %8, %cst_4 [1] : vector<8x128xf32> to vector<8xf32>
    %10 = vector.shape_cast %9 : vector<8xf32> to vector<8x1xf32>
    %11 = arith.mulf %4, %4 : vector<8x128xf32>
    %cst_5 = arith.constant dense<0.000000e+00> : vector<8xf32>
    %12 = vector.multi_reduction <add>, %11, %cst_5 [1] : vector<8x128xf32> to vector<8xf32>
    %13 = vector.shape_cast %12 : vector<8xf32> to vector<8x1xf32>
    %cst_6 = arith.constant 1.000000e-16 : f32
    %14 = vector.broadcast %cst_6 : f32 to vector<8x1xf32>
    %15 = arith.maximumf %10, %14 : vector<8x1xf32>
    %16 = math.rsqrt %15 : vector<8x1xf32>
    %17 = arith.mulf %7, %16 : vector<8x1xf32>
    %cst_7 = arith.constant 1.000000e-16 : f32
    %18 = vector.broadcast %cst_7 : f32 to vector<8x1xf32>
    %19 = arith.maximumf %13, %18 : vector<8x1xf32>
    %20 = math.rsqrt %19 : vector<8x1xf32>
    %21 = arith.mulf %17, %20 : vector<8x1xf32>
    %c0_8 = arith.constant 0 : index
    %c0_9 = arith.constant 0 : index
    %22 = vector.load %arg4[%c0_8, %c0_9] : memref<8x1xf32, #tpu.memory_space<vmem>>, vector<8x1xf32>
    %23 = arith.subf %21, %22 : vector<8x1xf32>
    %c0_10 = arith.constant 0 : index
    %c0_11 = arith.constant 0 : index
    %24 = vector.load %arg6[%c0_10, %c0_11] : memref<1x1xf32, #tpu.memory_space<vmem>>, vector<1x1xf32>
    %25 = arith.mulf %23, %23 : vector<8x1xf32>
    %26 = vector.shape_cast %25 : vector<8x1xf32> to vector<1x8x1xf32>
    %cst_12 = arith.constant dense<0.000000e+00> : vector<1xf32>
    %27 = vector.multi_reduction <add>, %26, %cst_12 [1, 2] : vector<1x8x1xf32> to vector<1xf32>
    %28 = vector.shape_cast %27 : vector<1xf32> to vector<1x1x1xf32>
    %29 = vector.extract %28[0, 0, 0] : f32 from vector<1x1x1xf32>
    %30 = vector.broadcast %29 : f32 to vector<1x1xf32>
    %31 = arith.addf %24, %30 : vector<1x1xf32>
    %c0_13 = arith.constant 0 : index
    %c0_14 = arith.constant 0 : index
    %32 = vector.load %arg6[%c0_13, %c0_14] : memref<1x1xf32, #tpu.memory_space<vmem>>, vector<1x1xf32>
    tpu.vector_store %arg6[%c0_13, %c0_14], %31 {strides = array<i32>} : memref<1x1xf32, #tpu.memory_space<vmem>>, vector<1x1xf32>,
    %c1_i32 = arith.constant 1 : i32
    %33 = arith.cmpi eq, %arg1, %c1_i32 : i32
    %34 = arith.extui %33 : i1 to i32
    %c0_i32_15 = arith.constant 0 : i32
    %35 = arith.cmpi ne, %34, %c0_i32_15 : i32
    scf.if %35 {
      %c0_16 = arith.constant 0 : index
      %c0_17 = arith.constant 0 : index
      %36 = vector.load %arg6[%c0_16, %c0_17] : memref<1x1xf32, #tpu.memory_space<vmem>>, vector<1x1xf32>
      %37 = vector.shape_cast %36 : vector<1x1xf32> to vector<1x1x1xf32>
      %cst_18 = arith.constant dense<0.000000e+00> : vector<1xf32>
      %38 = vector.multi_reduction <add>, %37, %cst_18 [1, 2] : vector<1x1x1xf32> to vector<1xf32>
      %39 = vector.shape_cast %38 : vector<1xf32> to vector<1x1x1xf32>
      %40 = vector.extract %39[0, 0, 0] : f32 from vector<1x1x1xf32>
      %41 = vector.broadcast %40 : f32 to vector<8x128xf32>
      %c0_19 = arith.constant 0 : index
      %c0_20 = arith.constant 0 : index
      %42 = vector.load %arg5[%c0_19, %c0_20] : memref<8x128xf32, #tpu.memory_space<vmem>>, vector<8x128xf32>
      tpu.vector_store %arg5[%c0_19, %c0_20], %41 {strides = array<i32>} : memref<8x128xf32, #tpu.memory_space<vmem>>, vector<8x128xf32>,
    } else {
    }
    return
  }
  func.func @transform_0(%arg0: i32, %arg1: i32) -> (i32, i32) {
    %c2_i32 = arith.constant 2 : i32
    %0 = arith.muli %arg0, %c2_i32 : i32
    %1 = arith.addi %0, %arg1 : i32
    %c0_i32 = arith.constant 0 : i32
    %c0_i32_0 = arith.constant 0 : i32
    return %1, %c0_i32 : i32, i32
  }
  func.func @transform_1(%arg0: i32, %arg1: i32) -> (i32, i32) {
    %c2_i32 = arith.constant 2 : i32
    %0 = arith.muli %arg0, %c2_i32 : i32
    %1 = arith.addi %0, %arg1 : i32
    %c0_i32 = arith.constant 0 : i32
    %c0_i32_0 = arith.constant 0 : i32
    return %1, %c0_i32 : i32, i32
  }
  func.func @transform_2(%arg0: i32, %arg1: i32) -> (i32, i32) {
    %c2_i32 = arith.constant 2 : i32
    %0 = arith.muli %arg0, %c2_i32 : i32
    %1 = arith.addi %0, %arg1 : i32
    %c0_i32 = arith.constant 0 : i32
    %c0_i32_0 = arith.constant 0 : i32
    return %1, %c0_i32 : i32, i32
  }
  func.func @transform_3(%arg0: i32, %arg1: i32) -> (i32, i32) {
    %c0_i32 = arith.constant 0 : i32
    %c0_i32_0 = arith.constant 0 : i32
    return %arg0, %c0_i32 : i32, i32
  }
}

</mosaic_0001>

<bundles_post_ra>
// kernel: tpu_custom_call.1
= control target key start
LH: loop header
LB: loop body
LE: loop exit
PB: predicated region body
PF: predicated region fallthrough
CT: control target
= control target key end

     0   :  { %8 = vsyncpa [#allocation4], 0  ;;  %s789_s0 = inlined_call_operand.vmem [shape: f32[16,128], index: 0, kind: input, shape index: {}]   ;;  %s790_s1 = inlined_call_operand.hbm [shape: f32[16,128], index: 1, kind: input, shape index: {}]   ;;  %s791_s2 = inlined_call_operand.vmem [shape: f32[16,1], index: 2, kind: input, shape index: {}]   ;;  %s792_s3 = inlined_call_operand.hbm [shape: f32[8,128], index: 3, kind: output, shape index: {}]  }
   0x1   :  { %10 = vsyncpa [#allocation4 + $0x1], 0 }
   0x2   :  { %11 = vsyncpa [#allocation5], 0  ;;  %s629_s12 = smov 0   ;;  %s631_s13 = smov 0  }
   0x3   :  { %s633_s14 = smov 0   ;;  %s635_s15 = smov 0  }
   0x4   :  { %s637_s16 = smov 0   ;;  %s639_s17 = smov 0  }
   0x5 LB: > { %s408_s18 = sadd.s32 4294967295, %s604_s17   ;;  %s26_s19 = sadd.s32 1, %s600_s16  ;;  %s604_s17 = sphi %s639_s17, %s17_s17   ;;  %s600_s16 = sphi %s637_s16, %s803_s16   ;;  %s596_s15 = sphi %s635_s15, %s802_s15   ;;  %s592_s14 = sphi %s633_s14, %s801_s14   ;;  %s588_s13 = sphi %s631_s13, %s800_s13   ;;  %s584_s12 = sphi %s629_s12, %s799_s12  }
   0x6   : > { %p27_p0 = scmp.ge.s32.totalorder %s26_s19, 2  ;;  %s70_s20 = sadd.s32 1, %s592_s14 }
   0x7   : > { %p77_p1 = scmp.ne.s32.totalorder %s592_s14, %s588_s13  ;;  %p78_p2 = scmp.eq.s32.totalorder %s604_s17, 0 }
   0x8   : > { %s805_s19 = smov (%p27_p0, %s26_s19), 0  ;;  %p83_p4 = scmp.ne.s32.totalorder %s588_s13, %s584_s12 }
   0x9   : > { %p665_p3 = por %p78_p2, %p77_p1  ;;  %s67_s22 = ssub.s32 %s600_s16, %s805_s19 }
   0xa   : > { %p84_p5 = scmp.eq.s32.totalorder %s408_s18, 0  ;;  %p68_p6 = scmp.eq.s32.totalorder %s67_s22, 0 }
   0xb   : > { %p437_p8 = scmp.lt.s32.totalorder %s604_s17, 2  ;;  %s174_s25 = sand.u32 1, %s592_s14  }
   0xc   : > { %p674_p7 = por %p84_p5, %p83_p4  ;;  %s412_s26 = sshll.u32 %s600_s16, 7 }
   0xd   : > { %s680_s24 = scalar_select %p68_p6, %s592_s14, %s70_s20  }
   0xe   : > { %s411_s27 = sshll.u32 %s174_s25, 3  ;;  %s687_s30 = scalar_lea.hbm %s790_s1, %s412_s26 }
   0xf   : > { %s178_s4 = scalar_lea.vmem [#allocation3], %s411_s27  ;;  %p691_p9 = pnand %p437_p8, %p665_p3 }
  0x10   : > { %s187_s5 = sshll.u32 %s178_s4, 4  ;;  %s175_s7 = scalar_lea.sflag [#allocation4], %s174_s25  ;;  %s695_s5 = int_to_ptr.vmem [resolvable:$true] %s187_s5 }
  0x11   : > { %s494_s8 = scalar_lea.hbm %s687_s30, 128  ;;  %p496_p13 = pneg %p691_p9 }
  0x12   : > { %p495_p12 = scmp.ne.s32.totalorder %s687_s30, %s494_s8  ;;  %s499_s11 = scalar_lea.hbm %s790_s1, 256 }
  0x13   : > { %p500_p2 = scmp.lt.u32.totalorder %s687_s30, %s790_s1  ;;  %p501_p3 = scmp.lt.u32.totalorder %s499_s11, %s494_s8 }
  0x14   : > { %p497_p0 = pnand %p496_p13, %p495_p12  ;;  %p503_p5 = scmp.lt.u32.totalorder %s494_s8, %s687_s30 }
  0x15   : > { %p502_p4 = por %p501_p3, %p500_p2 }
  0x16   : > { %p498_p1 = pneg %p497_p0 }
  0x17   : > { %p504_p6 = por %p503_p5, %p502_p4 }
  0x19   : > { %p505_p8 = pnand %p504_p6, %p498_p1 }
  0x1b   : > { %508 = shalt.err (!%p505_p8)
}
  0x1c   : > { %s509_s21 = scalar_lea.vmem %s695_s5, 128  ;;  %s606_s22 = smov [#allocation3]  }
  0x1d   : > { %p510_p12 = scmp.ne.s32.totalorder %s695_s5, %s509_s21  ;;  %s514_s25 = sshll.u32 %s606_s22, 4  ;;  %s515_s25 = int_to_ptr.vmem [resolvable:$false] %s514_s25 }
  0x1e   : > { %s516_s26 = scalar_lea.vmem %s515_s25, 256  ;;  %p517_p11 = scmp.lt.s32.totalorder %s695_s5, %s515_s25 }
  0x1f   : > { %p512_p0 = pnand %p510_p12, %p496_p13  ;;  %p518_p2 = scmp.lt.s32.totalorder %s516_s26, %s509_s21 }
  0x21   : > { %p513_p10 = pneg %p512_p0  ;;  %p519_p3 = por %p518_p2, %p517_p11 }
  0x23   : > { %p520_p4 = pnand %p519_p3, %p513_p10 }
  0x25   : > { %523 = shalt.err (!%p520_p4)
}
  0x26   : > { %436 = dma.hbm_to_vmem [thread:$0]  (!%p691_p9), %s687_s30, 128, %s695_s5, %s175_s7  }
  0x27   : > { %p796_p1 = scmp.lt.s32.totalorder %s604_s17, 3  ;;  %p797_p5 = scmp.ge.s32.totalorder %s604_s17, 1 }
  0x29   : > { %p204_p13 = pnand %p797_p5, %p796_p1 }
  0x2a   : > { %s209_s27 = sand.u32 (!%p204_p13), 1, %s588_s13  }
  0x2b   : > { %207 = sbr.rel (%p204_p13) target bundleno = 522 (0x20a), region = 32  ;;  %s414_s28 = sshll.u32 (!%p204_p13), %s209_s27, 3 }
  0x2c   : > { %s210_s29 = scalar_lea.sflag (!%p204_p13), [#allocation4], %s209_s27  ;;  %s213_s4 = scalar_lea.vmem (!%p204_p13), [#allocation3], %s414_s28 }
  0x32   : > { %575 = dma.done.wait (%p674_p7), %s210_s29, 128  }
  0x33   : > { %577 = vsyncadd (%p674_p7), %s210_s29, 4294967168  ;;  %p245_p10 = scmp.lt.s32.totalorder %s596_s15, 1  ;;  %p417_p9 = scmp.ne.s32.totalorder %s596_s15, 0 }
  0x34   : > { %vm265_vm0 = vcmask (!%p417_p9), 0   ;;  %v607_v0 = vmov (!%p417_p9), 0.0  }
  0x35   : > { %s246_s6 = scalar_select %p245_p10, %s596_s15, 1 }
  0x36   : > { %264 = sbr.rel (%p417_p9) target bundleno = 61 (0x3d), region = 40  ;;  %266 = vst.msk [vmem:[#allocation2] sm:$0x1] (!%p417_p9), %vm265_vm0, %v607_v0 }
  0x37   : > { %s415_s30 = sshll.u32 %s246_s6, 3 }
  0x38   : > { %s248_s8 = scalar_lea.vmem %s789_s0, %s415_s30  ;;  %s258_s11 = scalar_lea.vmem %s791_s2, %s415_s30 }
  0x3d PF: > { %v267_v1 = vld [vmem:[%s248_s8] sm:$0xff]  ;;  %vm288_vm1 = vcmask 7168   ;;  %vm301_vm2 = vcmask 0   ;;  %p418_p7 = scmp.ne.s32.totalorder %s596_s15, 1 }
  0x3e   : > { %v268_v2 = vld [vmem:[%s213_s4] sm:$0xff]  ;;  %v272_v3 = vmul.f32 %v267_v1, %v267_v1  ;;  %v286_v26 = vld [vmem:[#allocation2] sm:$0x1] }
  0x3f   : > { %v269_v4 = vmul.f32 %v268_v2, %v267_v1  ;;  %v275_v5 = vmul.f32 %v268_v2, %v268_v2  ;;  %v284_v14 = vld [vmem:[%s258_s11] sm:$0xff] }
  0x40   : > { %273 = vadd.xlane.f32.xlu0 %v272_v3 }
  0x41   : > { %270 = vadd.xlane.f32.xlu1 %v269_v4 }
  0x44   : > { %276 = vadd.xlane.f32.xlu0 %v275_v5 }
  0xcd   : > { %v274_v6 = vpop.xlane.xlu0 %273 }
  0xce   : > { %v278_v7 = vmax.f32 %v274_v6, 1e-16  ;;  %v271_v11 = vpop.xlane.xlu1 %270 }
  0xd0   : > { %490 = vrsqrt.f32 %v278_v7 }
  0xd1   : > { %v277_v8 = vpop.xlane.xlu0 %276 }
  0xd2   : > { %v281_v9 = vmax.f32 %v277_v8, 1e-16 }
  0xd4   : > { %492 = vrsqrt.f32 %v281_v9 }
  0xda   : > { %v491_v10 = vpop.eup %490 }
  0xdb   : > { %v280_v12 = vmul.f32 %v491_v10, %v271_v11 }
  0xde   : > { %v493_v13 = vpop.eup %492 }
  0xdf   : > { %v283_v15 = vmul.f32 %v493_v13, %v280_v12 }
  0xe1   : > { %v285_v16 = vsub.f32 %v283_v15, %v284_v14 }
  0xe3   : > { %v287_v17 = vmul.f32 %v285_v16, %v285_v16 }
  0xe5   : > { %v289_v18 = vsel %vm288_vm1, %v287_v17, 0.0 }
  0xe6   : > { %290 = vadd.xlane.f32.xlu1 %v289_v18 }
 0x173   : > { %v291_v19 = vpop.xlane.xlu1 %290 }
 0x174   : > { %v292_v20 = vrot.slane %v291_v19, 4 }
 0x176   : > { %v293_v21 = vadd.f32 %v292_v20, %v291_v19 }
 0x178   : > { %v294_v22 = vrot.slane %v293_v21, 2 }
 0x17a   : > { %v295_v23 = vadd.f32 %v294_v22, %v293_v21 }
 0x17c   : > { %v296_v24 = vrot.slane %v295_v23, 1 }
 0x17e   : > { %v297_v25 = vadd.f32 %v296_v24, %v295_v23 }
 0x180   : > { %423 = vpush %v297_v25 }
 0x1af   : > { %306 = sbr.rel (%p418_p7) target bundleno = 497 (0x1f1), region = 44 }
 0x1b1   : > { %s424_s23 = spop %423 }
 0x1b2   : > { %v299_v27 = vstv %s424_s23 }
 0x1b3   : > { %v300_v28 = vadd.f32 %v299_v27, %v286_v26 }
 0x1b5   : > { %302 = vst.msk [vmem:[#allocation2] sm:$0x1] %vm301_vm2, %v300_v28 }
 0x1bc   : > { %v307_v29 = vld [vmem:[#allocation2] sm:$0x1] }
 0x1bd   : > { %425 = vpush %v307_v29 }
 0x1ee   : > { %s426_s12 = spop %425 }
 0x1ef   : > { %v310_v30 = vstv %s426_s12 }
 0x1f0   : > { %311 = vst [vmem:[#allocation6] sm:$0xff] %v310_v30 }
 0x1f1 PF: > { %p745_p11 = scmp.eq.s32.totalorder %s408_s18, 1  ;;  %s608_s21 = smov [#allocation6]  }
 0x1f2   : > { %s321_s22 = sshll.u32 %s608_s21, 4  ;;  %s322_s22 = int_to_ptr.vmem [resolvable:$true] %s321_s22 }
 0x1f3   : > { %s524_s25 = scalar_lea.vmem %s322_s22, 128  ;;  %p531_p0 = scmp.lt.s32.totalorder %s322_s22, %s322_s22 }
 0x1f4   : > { %p525_p6 = scmp.ne.s32.totalorder %s322_s22, %s524_s25  ;;  %p532_p2 = scmp.lt.s32.totalorder %s524_s25, %s524_s25 }
 0x1f6   : > { %p526_p8 = pnand %p525_p6, %p745_p11  ;;  %p533_p3 = por %p532_p2, %p531_p0 }
 0x1f8   : > { %p527_p12 = pneg %p526_p8 }
 0x1fa   : > { %p534_p4 = pnand %p533_p3, %p527_p12 }
 0x1fc   : > { %537 = shalt.err (!%p534_p4)
}
 0x1fd   : > { %s538_s18 = scalar_lea.hbm %s792_s3, 128 }
 0x1fe   : > { %p539_p1 = scmp.ne.s32.totalorder %s792_s3, %s538_s18  ;;  %p544_p10 = scmp.lt.u32.totalorder %s538_s18, %s792_s3 }
 0x200   : > { %p540_p5 = pnand %p539_p1, %p745_p11 }
 0x202   : > { %p541_p13 = pneg %p540_p5 }
 0x204   : > { %p546_p9 = pnand %p544_p10, %p541_p13 }
 0x206   : > { %549 = shalt.err (!%p546_p9)
}
 0x207   : > { %430 = dma.vmem_to_hbm [thread:$0]  (%p745_p11), %s322_s22, 128, %s792_s3, [#allocation5]  }
 0x208   : > { %579 = dma.done.wait (%p745_p11), [#allocation5], 128  }
 0x209   : > { %581 = vsyncadd (%p745_p11), [#allocation5], 4294967168 }
 0x20a PF: > { %s17_s17 = sadd.s32 1, %s604_s17   ;;  %s799_s12 = smov %s588_s13 }
 0x20b   : > { %p14_p7 = scmp.ge.s32.totalorder %s17_s17, 4   ;;  %s800_s13 = smov %s592_s14 }
 0x20c   : > { %s801_s14 = smov %s680_s24  ;;  %s802_s15 = smov %s600_s16 }
 0x20d   : > { %s803_s16 = smov %s805_s19  ;;  %16 = sbr.rel (!%p14_p7) target bundleno = 5 (0x5), region = 84 }
 0x214   :  { %334 = vsyncpa [#allocation4], 1 }
 0x215   :  { %336 = vsyncpa [#allocation4 + $0x1], 1 }
 0x216   :  { %337 = vsyncpa [#allocation5], 1 }
 0x217   :  { %339 = vsyncpa [#allocation5 + $0x1], 1 }

</bundles_post_ra>
